<compile_context>
chip_gen: v5e
topology: v5e:2x2
jax: 0.10.0
libtpu: 0.0.40
codegen_flags: <defaults>
</compile_context>

<pallas_src>
import functools

import jax
import jax.numpy as jnp
from jax import lax
from jax.experimental import pallas as pl
from jax.experimental.pallas import tpu as pltpu

_BN_EPS = 1e-5


def _round_up(x, m):
    return (x + m - 1) // m * m


def _choose_tiles(n):
    """(query tile, key tile) for kernel B; key tile always divides query tile."""
    if n >= 2048:
        return 512, 256
    if n > 512:
        return 256, 256
    if n > 16:
        # guarantee >= 2 q-tiles so both v7x TensorCores get work
        t = _round_up((n + 1) // 2, 8)
        return t, t
    t = _round_up(max(n, 1), 8)
    return t, t


def _vmem_limit_bytes():
    """Per-generation VMEM budget: physical capacity minus headroom, clamped."""
    try:
        cap = int(pltpu.get_tpu_info().vmem_capacity_bytes)
    except Exception:  # pragma: no cover - conservative fallback
        cap = 64 * 1024 * 1024
    return max(32 * 1024 * 1024, min(cap - 16 * 1024 * 1024, 96 * 1024 * 1024))


# --------------------------------------------------------------------------
# Kernel A: h2 = h @ W_h + b_h ; h3 = pre_h @ W_p + b_p   (BN already folded)
# --------------------------------------------------------------------------
def _conv_kernel(h_ref, p_ref, bias_ref, wh_ref, wp_ref, h2_ref, h3_ref):
    bh = bias_ref[0:1, :]                    # [1, Cp] f32 (BN-folded bias)
    bp = bias_ref[1:2, :]
    h2 = jnp.dot(h_ref[...], wh_ref[...],
                 preferred_element_type=jnp.float32) + bh
    h3 = jnp.dot(p_ref[...], wp_ref[...],
                 preferred_element_type=jnp.float32) + bp
    h2_ref[...] = h2.astype(h2_ref.dtype)    # bf16 writeback (halves HBM traffic)
    h3_ref[...] = h3.astype(h3_ref.dtype)


# --------------------------------------------------------------------------
# Kernel B: flash-style  softmax(h2 @ h2.T) @ h3  streamed over key tiles,
# then the second (feature-axis) softmax and the elementwise combine.
# --------------------------------------------------------------------------
def _attn_kernel(h2q_ref, h3q_ref, h2k_ref, h3k_ref, out_ref,
                 m_sc, l_sc, acc_sc, *, n_rows, n_cols, tile_k):
    kv = pl.program_id(1)

    @pl.when(kv == 0)
    def _():
        m_sc[...] = jnp.full_like(m_sc, -jnp.inf)
        l_sc[...] = jnp.zeros_like(l_sc)
        acc_sc[...] = jnp.zeros_like(acc_sc)

    # Skip key tiles that are entirely padding (possible when Tq > Tk).
    @pl.when(kv * tile_k < n_rows)
    def _():
        q = h2q_ref[...]                              # bf16 [Tq, Cp]
        kb = h2k_ref[...]                             # bf16 [Tk, Cp]
        s = lax.dot_general(q, kb, (((1,), (1,)), ((), ())),
                            preferred_element_type=jnp.float32)   # [Tq, Tk]
        if n_rows % tile_k != 0:
            # A partially padded key tile exists; mask rows >= n_rows out of
            # the first softmax (fully padded tiles were already skipped).
            key_idx = lax.broadcasted_iota(jnp.int32, s.shape, 1) + kv * tile_k
            s = jnp.where(key_idx < n_rows, s, -1e30)

        m_prev = m_sc[...]
        m_new = jnp.maximum(m_prev, jnp.max(s, axis=-1, keepdims=True))
        alpha = jnp.exp(m_prev - m_new)
        p = jnp.exp(s - m_new)
        l_sc[...] = alpha * l_sc[...] + jnp.sum(p, axis=-1, keepdims=True)
        acc_sc[...] = alpha * acc_sc[...] + jnp.dot(
            p.astype(jnp.bfloat16), h3k_ref[...],
            preferred_element_type=jnp.float32)
        m_sc[...] = m_new

    @pl.when(kv == pl.num_programs(1) - 1)
    def _():
        # finalize first softmax and its matmul:  sim = softmax(s) @ h3
        sim = acc_sc[...] * pl.reciprocal(l_sc[...], approx=True)   # [Tq, Cp]
        if n_cols != sim.shape[-1]:
            # mask padded feature columns out of the second softmax
            col = lax.broadcasted_iota(jnp.int32, sim.shape, 1)
            sim = jnp.where(col < n_cols, sim, -1e30)
        m2 = jnp.max(sim, axis=-1, keepdims=True)
        e = jnp.exp(sim - m2)
        sim2 = e / jnp.sum(e, axis=-1, keepdims=True)   # exact (once per tile)
        h2q = h2q_ref[...].astype(jnp.float32)
        h3q = h3q_ref[...].astype(jnp.float32)
        out_ref[...] = (sim2 * h3q + h2q + h3q).astype(out_ref.dtype)


def cnn1_forward(h, pre_h, conv_w, conv_b, bn_gamma, bn_beta):
    """h, pre_h: [N, C]; conv_w: [C_out, C_in] (k=1 squeezed); conv_b: [C]."""
    N, C = h.shape
    f32, bf16 = jnp.float32, jnp.bfloat16
    h = h.astype(f32)
    pre_h = pre_h.astype(f32)
    gamma = bn_gamma.astype(f32)
    beta = bn_beta.astype(f32)
    w_t = conv_w.astype(f32).T                     # [Cin, Cout]
    b = conv_b.astype(f32)

    # ---- prologue (XLA): batch BN stats folded into the conv weight & bias ----
    def fold(x):
        mean = jnp.mean(x, axis=0)
        var = jnp.mean(jnp.square(x - mean[None, :]), axis=0)   # biased (training)
        scale = gamma * lax.rsqrt(var + _BN_EPS)
        shift = beta - mean * scale
        w_fold = (scale[:, None] * w_t).astype(bf16)            # [Cin, Cout]
        b_fold = shift @ w_t + b                                # [Cout] f32 (exact)
        return w_fold, b_fold

    wh, bh = fold(h)
    wp, bp = fold(pre_h)

    # ---- lane-dense / sublane-aligned padding & tile selection ----
    Cp = _round_up(C, 128)
    TQ, TK = _choose_tiles(N)
    Np = _round_up(N, TQ)                          # TK | TQ | Np
    pc = Cp - C

    h_pad = jnp.pad(h, ((0, Np - N), (0, pc))).astype(bf16)
    pre_pad = jnp.pad(pre_h, ((0, Np - N), (0, pc))).astype(bf16)
    wh_pad = jnp.pad(wh, ((0, pc), (0, pc)))
    wp_pad = jnp.pad(wp, ((0, pc), (0, pc)))
    bias = jnp.pad(jnp.stack([bh, bp]), ((0, 0), (0, pc)))      # [2, Cp] f32

    vmem = _vmem_limit_bytes()

    # ---- kernel A: two fused (BN-folded) conv matmuls, row-tiled & pipelined ----
    n_a = Np // TQ
    h2_full, h3_full = pl.pallas_call(
        _conv_kernel,
        out_shape=(jax.ShapeDtypeStruct((Np, Cp), bf16),
                   jax.ShapeDtypeStruct((Np, Cp), bf16)),
        grid_spec=pltpu.PrefetchScalarGridSpec(
            num_scalar_prefetch=0,
            grid=(n_a,),
            in_specs=[pl.BlockSpec((TQ, Cp), lambda i: (i, 0)),
                      pl.BlockSpec((TQ, Cp), lambda i: (i, 0)),
                      pl.BlockSpec((2, Cp), lambda i: (0, 0)),
                      pl.BlockSpec((Cp, Cp), lambda i: (0, 0)),
                      pl.BlockSpec((Cp, Cp), lambda i: (0, 0))],
            out_specs=[pl.BlockSpec((TQ, Cp), lambda i: (i, 0)),
                       pl.BlockSpec((TQ, Cp), lambda i: (i, 0))]),
        compiler_params=pltpu.CompilerParams(
            dimension_semantics=("parallel",),
            vmem_limit_bytes=vmem),
    )(h_pad, pre_pad, bias, wh_pad, wp_pad)

    # ---- kernel B: online-softmax attention-like block (never builds [N, N]) ----
    nq, nk = Np // TQ, Np // TK
    attn = functools.partial(_attn_kernel, n_rows=N, n_cols=C, tile_k=TK)
    out_full = pl.pallas_call(
        attn,
        out_shape=jax.ShapeDtypeStruct((Np, Cp), f32),
        grid_spec=pltpu.PrefetchScalarGridSpec(
            num_scalar_prefetch=0,
            grid=(nq, nk),
            in_specs=[pl.BlockSpec((TQ, Cp), lambda i, k: (i, 0)),   # h2 query tile
                      pl.BlockSpec((TQ, Cp), lambda i, k: (i, 0)),   # h3 query tile
                      pl.BlockSpec((TK, Cp), lambda i, k: (k, 0)),   # h2 key tile
                      pl.BlockSpec((TK, Cp), lambda i, k: (k, 0))],  # h3 key tile
            out_specs=pl.BlockSpec((TQ, Cp), lambda i, k: (i, 0)),
            scratch_shapes=[pltpu.VMEM((TQ, 1), f32),    # running max m
                            pltpu.VMEM((TQ, 1), f32),    # running denom l
                            pltpu.VMEM((TQ, Cp), f32)]), # running acc
        compiler_params=pltpu.CompilerParams(
            dimension_semantics=("parallel", "arbitrary"),
            vmem_limit_bytes=vmem),
    )(h2_full, h3_full, h2_full, h3_full)

    return out_full[:N, :C]


def _reference(h, pre_h, conv_w, conv_b, gamma, beta):
    """Pure-JAX f32 reference matching the PyTorch forward."""
    def bn(x):
        m = jnp.mean(x, axis=0, keepdims=True)
        v = jnp.mean(jnp.square(x - m), axis=0, keepdims=True)
        return (x - m) * lax.rsqrt(v + _BN_EPS) * gamma + beta

    hb = bn(h)
    pb = bn(pre_h)
    h2 = hb @ conv_w.T + conv_b
    h3 = pb @ conv_w.T + conv_b
    sim = jax.nn.softmax(h2 @ h2.T, axis=1)
    sim = jax.nn.softmax(sim @ h3, axis=1)
    return sim * h3 + h2 + h3


if __name__ == "__main__":
    N, C = 8, 32          # batch rows, in_dim
    key = jax.random.PRNGKey(0)
    k_h, k_p, k_w, k_b = jax.random.split(key, 4)

    h = jax.random.normal(k_h, (N, C), dtype=jnp.float32)
    pre_h = jax.random.normal(k_p, (N, C), dtype=jnp.float32)

    # Deterministic parameter init (Conv1d-like uniform, BN affine defaults).
    bound = 1.0 / jnp.sqrt(jnp.float32(C))
    conv_w = jax.random.uniform(k_w, (C, C), jnp.float32, -bound, bound)  # [C_out, C_in]
    conv_b = jax.random.uniform(k_b, (C,), jnp.float32, -bound, bound)
    bn_gamma = jnp.ones((C,), jnp.float32)
    bn_beta = jnp.zeros((C,), jnp.float32)

    out = jax.jit(cnn1_forward)(h, pre_h, conv_w, conv_b, bn_gamma, bn_beta)
    jax.block_until_ready(out)

    ref = _reference(h, pre_h, conv_w, conv_b, bn_gamma, bn_beta)
    assert out.shape == (N, C)
    # bf16 MXU operands + bf16-stored h2/h3 + approx reciprocal -> small
    # deviation vs the f32 reference.
    assert jnp.allclose(out, ref, rtol=5e-2, atol=7.5e-2), \
        float(jnp.max(jnp.abs(out - ref)))
    print("KERNEL_OK")
</pallas_src>

<mosaic_0001>
module attributes {stable_mosaic.version = 11 : i64} {
  func.func @_conv_kernel(%arg0: i32, %arg1: memref<8x128xbf16, #tpu.memory_space<vmem>>, %arg2: memref<8x128xbf16, #tpu.memory_space<vmem>>, %arg3: memref<2x128xf32, #tpu.memory_space<vmem>>, %arg4: memref<128x128xbf16, #tpu.memory_space<vmem>>, %arg5: memref<128x128xbf16, #tpu.memory_space<vmem>>, %arg6: memref<8x128xbf16, #tpu.memory_space<vmem>>, %arg7: memref<8x128xbf16, #tpu.memory_space<vmem>>) attributes {dimension_semantics = [#tpu.dimension_semantics<parallel>], iteration_bounds = array<i64: 1>, scalar_prefetch = 0 : i64, scratch_operands = 0 : i64, tpu.core_type = #tpu.core_type<tc>, window_params = [{transform_indices = @transform_0, window_bounds = array<i64: 8, 128>}, {transform_indices = @transform_1, window_bounds = array<i64: 8, 128>}, {pipeline_mode = #tpu.pipeline_mode<synchronous>, transform_indices = @transform_2, window_bounds = array<i64: 2, 128>}, {pipeline_mode = #tpu.pipeline_mode<synchronous>, transform_indices = @transform_3, window_bounds = array<i64: 128, 128>}, {pipeline_mode = #tpu.pipeline_mode<synchronous>, transform_indices = @transform_4, window_bounds = array<i64: 128, 128>}, {transform_indices = @transform_5, window_bounds = array<i64: 8, 128>}, {transform_indices = @transform_6, window_bounds = array<i64: 8, 128>}]} {
    %c0 = arith.constant 0 : index
    %c0_0 = arith.constant 0 : index
    %0 = vector.load %arg3[%c0, %c0_0] : memref<2x128xf32, #tpu.memory_space<vmem>>, vector<1x128xf32>
    %c1 = arith.constant 1 : index
    %c0_1 = arith.constant 0 : index
    %1 = vector.load %arg3[%c1, %c0_1] : memref<2x128xf32, #tpu.memory_space<vmem>>, vector<1x128xf32>
    %c0_2 = arith.constant 0 : index
    %c0_3 = arith.constant 0 : index
    %2 = vector.load %arg1[%c0_2, %c0_3] : memref<8x128xbf16, #tpu.memory_space<vmem>>, vector<8x128xbf16>
    %c0_4 = arith.constant 0 : index
    %c0_5 = arith.constant 0 : index
    %3 = vector.load %arg4[%c0_4, %c0_5] : memref<128x128xbf16, #tpu.memory_space<vmem>>, vector<128x128xbf16>
    %cst = arith.constant dense<0.000000e+00> : vector<8x128xf32>
    %4 = tpu.matmul %2, %3, %cst {dimension_numbers = #tpu.dot_dimension_numbers<[1], [0], [0], [1], [0, 0, 1, 1], [], []>} : vector<8x128xbf16>, vector<128x128xbf16>, vector<8x128xf32> -> vector<8x128xf32>
    %5 = vector.broadcast %0 : vector<1x128xf32> to vector<8x128xf32>
    %6 = arith.addf %4, %5 : vector<8x128xf32>
    %c0_6 = arith.constant 0 : index
    %c0_7 = arith.constant 0 : index
    %7 = vector.load %arg2[%c0_6, %c0_7] : memref<8x128xbf16, #tpu.memory_space<vmem>>, vector<8x128xbf16>
    %c0_8 = arith.constant 0 : index
    %c0_9 = arith.constant 0 : index
    %8 = vector.load %arg5[%c0_8, %c0_9] : memref<128x128xbf16, #tpu.memory_space<vmem>>, vector<128x128xbf16>
    %cst_10 = arith.constant dense<0.000000e+00> : vector<8x128xf32>
    %9 = tpu.matmul %7, %8, %cst_10 {dimension_numbers = #tpu.dot_dimension_numbers<[1], [0], [0], [1], [0, 0, 1, 1], [], []>} : vector<8x128xbf16>, vector<128x128xbf16>, vector<8x128xf32> -> vector<8x128xf32>
    %10 = vector.broadcast %1 : vector<1x128xf32> to vector<8x128xf32>
    %11 = arith.addf %9, %10 : vector<8x128xf32>
    %12 = arith.truncf %6 : vector<8x128xf32> to vector<8x128xbf16>
    %c0_11 = arith.constant 0 : index
    %c0_12 = arith.constant 0 : index
    %13 = vector.load %arg6[%c0_11, %c0_12] : memref<8x128xbf16, #tpu.memory_space<vmem>>, vector<8x128xbf16>
    tpu.vector_store %arg6[%c0_11, %c0_12], %12 {strides = array<i32>} : memref<8x128xbf16, #tpu.memory_space<vmem>>, vector<8x128xbf16>,
    %14 = arith.truncf %11 : vector<8x128xf32> to vector<8x128xbf16>
    %c0_13 = arith.constant 0 : index
    %c0_14 = arith.constant 0 : index
    %15 = vector.load %arg7[%c0_13, %c0_14] : memref<8x128xbf16, #tpu.memory_space<vmem>>, vector<8x128xbf16>
    tpu.vector_store %arg7[%c0_13, %c0_14], %14 {strides = array<i32>} : memref<8x128xbf16, #tpu.memory_space<vmem>>, vector<8x128xbf16>,
    return
  }
  func.func @transform_0(%arg0: i32) -> (i32, i32) {
    %c0_i32 = arith.constant 0 : i32
    %c0_i32_0 = arith.constant 0 : i32
    return %arg0, %c0_i32 : i32, i32
  }
  func.func @transform_1(%arg0: i32) -> (i32, i32) {
    %c0_i32 = arith.constant 0 : i32
    %c0_i32_0 = arith.constant 0 : i32
    return %arg0, %c0_i32 : i32, i32
  }
  func.func @transform_2(%arg0: i32) -> (i32, i32) {
    %c0_i32 = arith.constant 0 : i32
    %c0_i32_0 = arith.constant 0 : i32
    %c0_i32_1 = arith.constant 0 : i32
    return %c0_i32, %c0_i32_0 : i32, i32
  }
  func.func @transform_3(%arg0: i32) -> (i32, i32) {
    %c0_i32 = arith.constant 0 : i32
    %c0_i32_0 = arith.constant 0 : i32
    %c0_i32_1 = arith.constant 0 : i32
    return %c0_i32, %c0_i32_0 : i32, i32
  }
  func.func @transform_4(%arg0: i32) -> (i32, i32) {
    %c0_i32 = arith.constant 0 : i32
    %c0_i32_0 = arith.constant 0 : i32
    %c0_i32_1 = arith.constant 0 : i32
    return %c0_i32, %c0_i32_0 : i32, i32
  }
  func.func @transform_5(%arg0: i32) -> (i32, i32) {
    %c0_i32 = arith.constant 0 : i32
    %c0_i32_0 = arith.constant 0 : i32
    return %arg0, %c0_i32 : i32, i32
  }
  func.func @transform_6(%arg0: i32) -> (i32, i32) {
    %c0_i32 = arith.constant 0 : i32
    %c0_i32_0 = arith.constant 0 : i32
    return %arg0, %c0_i32 : i32, i32
  }
}

module attributes {stable_mosaic.version = 11 : i64} {
  func.func @_attn_kernel(%arg0: i32, %arg1: i32, %arg2: memref<8x128xbf16, #tpu.memory_space<vmem>>, %arg3: memref<8x128xbf16, #tpu.memory_space<vmem>>, %arg4: memref<8x128xbf16, #tpu.memory_space<vmem>>, %arg5: memref<8x128xbf16, #tpu.memory_space<vmem>>, %arg6: memref<8x128xf32, #tpu.memory_space<vmem>>, %arg7: memref<8x1xf32, #tpu.memory_space<vmem>>, %arg8: memref<8x1xf32, #tpu.memory_space<vmem>>, %arg9: memref<8x128xf32, #tpu.memory_space<vmem>>) attributes {dimension_semantics = [#tpu.dimension_semantics<parallel>, #tpu.dimension_semantics<arbitrary>], iteration_bounds = array<i64: 1, 1>, scalar_prefetch = 0 : i64, scratch_operands = 3 : i64, tpu.core_type = #tpu.core_type<tc>, window_params = [{transform_indices = @transform_0, window_bounds = array<i64: 8, 128>}, {transform_indices = @transform_1, window_bounds = array<i64: 8, 128>}, {transform_indices = @transform_2, window_bounds = array<i64: 8, 128>}, {transform_indices = @transform_3, window_bounds = array<i64: 8, 128>}, {transform_indices = @transform_4, window_bounds = array<i64: 8, 128>}]} {
    %c0_i32 = arith.constant 0 : i32
    %0 = arith.cmpi eq, %arg1, %c0_i32 : i32
    %1 = arith.extui %0 : i1 to i32
    %c0_i32_0 = arith.constant 0 : i32
    %2 = arith.cmpi ne, %1, %c0_i32_0 : i32
    scf.if %2 {
      %cst = arith.constant 0xFF800000 : f32
      %10 = vector.broadcast %cst : f32 to vector<8x1xf32>
      %c0 = arith.constant 0 : index
      %c0_5 = arith.constant 0 : index
      %11 = vector.load %arg7[%c0, %c0_5] : memref<8x1xf32, #tpu.memory_space<vmem>>, vector<8x1xf32>
      tpu.vector_store %arg7[%c0, %c0_5], %10 {strides = array<i32>} : memref<8x1xf32, #tpu.memory_space<vmem>>, vector<8x1xf32>,
      %cst_6 = arith.constant 0.000000e+00 : f32
      %12 = vector.broadcast %cst_6 : f32 to vector<8x1xf32>
      %c0_7 = arith.constant 0 : index
      %c0_8 = arith.constant 0 : index
      %13 = vector.load %arg8[%c0_7, %c0_8] : memref<8x1xf32, #tpu.memory_space<vmem>>, vector<8x1xf32>
      tpu.vector_store %arg8[%c0_7, %c0_8], %12 {strides = array<i32>} : memref<8x1xf32, #tpu.memory_space<vmem>>, vector<8x1xf32>,
      %cst_9 = arith.constant 0.000000e+00 : f32
      %14 = vector.broadcast %cst_9 : f32 to vector<8x128xf32>
      %c0_10 = arith.constant 0 : index
      %c0_11 = arith.constant 0 : index
      %15 = vector.load %arg9[%c0_10, %c0_11] : memref<8x128xf32, #tpu.memory_space<vmem>>, vector<8x128xf32>
      tpu.vector_store %arg9[%c0_10, %c0_11], %14 {strides = array<i32>} : memref<8x128xf32, #tpu.memory_space<vmem>>, vector<8x128xf32>,
    } else {
    }
    %c8_i32 = arith.constant 8 : i32
    %3 = arith.muli %arg1, %c8_i32 : i32
    %c8_i32_1 = arith.constant 8 : i32
    %4 = arith.cmpi slt, %3, %c8_i32_1 : i32
    %5 = arith.extui %4 : i1 to i32
    %c0_i32_2 = arith.constant 0 : i32
    %6 = arith.cmpi ne, %5, %c0_i32_2 : i32
    scf.if %6 {
      %c0 = arith.constant 0 : index
      %c0_5 = arith.constant 0 : index
      %10 = vector.load %arg2[%c0, %c0_5] : memref<8x128xbf16, #tpu.memory_space<vmem>>, vector<8x128xbf16>
      %c0_6 = arith.constant 0 : index
      %c0_7 = arith.constant 0 : index
      %11 = vector.load %arg4[%c0_6, %c0_7] : memref<8x128xbf16, #tpu.memory_space<vmem>>, vector<8x128xbf16>
      %cst = arith.constant dense<0.000000e+00> : vector<8x8xf32>
      %12 = tpu.matmul %10, %11, %cst {dimension_numbers = #tpu.dot_dimension_numbers<[1], [1], [0], [0], [0, 0, 1, 0], [], []>} : vector<8x128xbf16>, vector<8x128xbf16>, vector<8x8xf32> -> vector<8x8xf32>
      %c0_8 = arith.constant 0 : index
      %c0_9 = arith.constant 0 : index
      %13 = vector.load %arg7[%c0_8, %c0_9] : memref<8x1xf32, #tpu.memory_space<vmem>>, vector<8x1xf32>
      %cst_10 = arith.constant dense<0xFF800000> : vector<8xf32>
      %14 = vector.multi_reduction <maximumf>, %12, %cst_10 [1] : vector<8x8xf32> to vector<8xf32>
      %15 = vector.shape_cast %14 : vector<8xf32> to vector<8x1xf32>
      %16 = arith.maximumf %13, %15 : vector<8x1xf32>
      %17 = arith.subf %13, %16 : vector<8x1xf32>
      %18 = math.exp %17 : vector<8x1xf32>
      %19 = vector.broadcast %16 : vector<8x1xf32> to vector<8x8xf32>
      %20 = arith.subf %12, %19 : vector<8x8xf32>
      %21 = math.exp %20 : vector<8x8xf32>
      %c0_11 = arith.constant 0 : index
      %c0_12 = arith.constant 0 : index
      %22 = vector.load %arg8[%c0_11, %c0_12] : memref<8x1xf32, #tpu.memory_space<vmem>>, vector<8x1xf32>
      %23 = arith.mulf %18, %22 : vector<8x1xf32>
      %cst_13 = arith.constant dense<0.000000e+00> : vector<8xf32>
      %24 = vector.multi_reduction <add>, %21, %cst_13 [1] : vector<8x8xf32> to vector<8xf32>
      %25 = vector.shape_cast %24 : vector<8xf32> to vector<8x1xf32>
      %26 = arith.addf %23, %25 : vector<8x1xf32>
      %c0_14 = arith.constant 0 : index
      %c0_15 = arith.constant 0 : index
      %27 = vector.load %arg8[%c0_14, %c0_15] : memref<8x1xf32, #tpu.memory_space<vmem>>, vector<8x1xf32>
      tpu.vector_store %arg8[%c0_14, %c0_15], %26 {strides = array<i32>} : memref<8x1xf32, #tpu.memory_space<vmem>>, vector<8x1xf32>,
      %c0_16 = arith.constant 0 : index
      %c0_17 = arith.constant 0 : index
      %28 = vector.load %arg9[%c0_16, %c0_17] : memref<8x128xf32, #tpu.memory_space<vmem>>, vector<8x128xf32>
      %29 = vector.broadcast %18 : vector<8x1xf32> to vector<8x128xf32>
      %30 = arith.mulf %29, %28 : vector<8x128xf32>
      %31 = arith.truncf %21 : vector<8x8xf32> to vector<8x8xbf16>
      %c0_18 = arith.constant 0 : index
      %c0_19 = arith.constant 0 : index
      %32 = vector.load %arg5[%c0_18, %c0_19] : memref<8x128xbf16, #tpu.memory_space<vmem>>, vector<8x128xbf16>
      %cst_20 = arith.constant dense<0.000000e+00> : vector<8x128xf32>
      %33 = tpu.matmul %31, %32, %cst_20 {dimension_numbers = #tpu.dot_dimension_numbers<[1], [0], [0], [1], [0, 0, 1, 1], [], []>} : vector<8x8xbf16>, vector<8x128xbf16>, vector<8x128xf32> -> vector<8x128xf32>
      %34 = arith.addf %30, %33 : vector<8x128xf32>
      %c0_21 = arith.constant 0 : index
      %c0_22 = arith.constant 0 : index
      %35 = vector.load %arg9[%c0_21, %c0_22] : memref<8x128xf32, #tpu.memory_space<vmem>>, vector<8x128xf32>
      tpu.vector_store %arg9[%c0_21, %c0_22], %34 {strides = array<i32>} : memref<8x128xf32, #tpu.memory_space<vmem>>, vector<8x128xf32>,
      %c0_23 = arith.constant 0 : index
      %c0_24 = arith.constant 0 : index
      %36 = vector.load %arg7[%c0_23, %c0_24] : memref<8x1xf32, #tpu.memory_space<vmem>>, vector<8x1xf32>
      tpu.vector_store %arg7[%c0_23, %c0_24], %16 {strides = array<i32>} : memref<8x1xf32, #tpu.memory_space<vmem>>, vector<8x1xf32>,
    } else {
    }
    %c0_i32_3 = arith.constant 0 : i32
    %7 = arith.cmpi eq, %arg1, %c0_i32_3 : i32
    %8 = arith.extui %7 : i1 to i32
    %c0_i32_4 = arith.constant 0 : i32
    %9 = arith.cmpi ne, %8, %c0_i32_4 : i32
    scf.if %9 {
      %c0 = arith.constant 0 : index
      %c0_5 = arith.constant 0 : index
      %10 = vector.load %arg9[%c0, %c0_5] : memref<8x128xf32, #tpu.memory_space<vmem>>, vector<8x128xf32>
      %c0_6 = arith.constant 0 : index
      %c0_7 = arith.constant 0 : index
      %11 = vector.load %arg8[%c0_6, %c0_7] : memref<8x1xf32, #tpu.memory_space<vmem>>, vector<8x1xf32>
      %12 = tpu.reciprocal %11 {approx = true} : vector<8x1xf32> -> vector<8x1xf32>
      %13 = vector.broadcast %12 : vector<8x1xf32> to vector<8x128xf32>
      %14 = arith.mulf %10, %13 : vector<8x128xf32>
      %15 = tpu.iota {dimensions = array<i32: 1>} : vector<8x128xi32>
      %c32_i32 = arith.constant 32 : i32
      %16 = vector.broadcast %c32_i32 : i32 to vector<8x128xi32>
      %17 = arith.cmpi slt, %15, %16 : vector<8x128xi32>
      %cst = arith.constant -1.000000e+30 : f32
      %18 = vector.broadcast %cst : f32 to vector<8x128xf32>
      %19 = arith.select %17, %14, %18 : vector<8x128xi1>, vector<8x128xf32>
      %cst_8 = arith.constant dense<0xFF800000> : vector<8xf32>
      %20 = vector.multi_reduction <maximumf>, %19, %cst_8 [1] : vector<8x128xf32> to vector<8xf32>
      %21 = vector.shape_cast %20 : vector<8xf32> to vector<8x1xf32>
      %22 = vector.broadcast %21 : vector<8x1xf32> to vector<8x128xf32>
      %23 = arith.subf %19, %22 : vector<8x128xf32>
      %24 = math.exp %23 : vector<8x128xf32>
      %cst_9 = arith.constant dense<0.000000e+00> : vector<8xf32>
      %25 = vector.multi_reduction <add>, %24, %cst_9 [1] : vector<8x128xf32> to vector<8xf32>
      %26 = vector.shape_cast %25 : vector<8xf32> to vector<8x1xf32>
      %27 = vector.broadcast %26 : vector<8x1xf32> to vector<8x128xf32>
      %28 = arith.divf %24, %27 : vector<8x128xf32>
      %c0_10 = arith.constant 0 : index
      %c0_11 = arith.constant 0 : index
      %29 = vector.load %arg2[%c0_10, %c0_11] : memref<8x128xbf16, #tpu.memory_space<vmem>>, vector<8x128xbf16>
      %30 = arith.extf %29 : vector<8x128xbf16> to vector<8x128xf32>
      %c0_12 = arith.constant 0 : index
      %c0_13 = arith.constant 0 : index
      %31 = vector.load %arg3[%c0_12, %c0_13] : memref<8x128xbf16, #tpu.memory_space<vmem>>, vector<8x128xbf16>
      %32 = arith.extf %31 : vector<8x128xbf16> to vector<8x128xf32>
      %33 = arith.mulf %28, %32 : vector<8x128xf32>
      %34 = arith.addf %33, %30 : vector<8x128xf32>
      %35 = arith.addf %34, %32 : vector<8x128xf32>
      %c0_14 = arith.constant 0 : index
      %c0_15 = arith.constant 0 : index
      %36 = vector.load %arg6[%c0_14, %c0_15] : memref<8x128xf32, #tpu.memory_space<vmem>>, vector<8x128xf32>
      tpu.vector_store %arg6[%c0_14, %c0_15], %35 {strides = array<i32>} : memref<8x128xf32, #tpu.memory_space<vmem>>, vector<8x128xf32>,
    } else {
    }
    return
  }
  func.func @transform_0(%arg0: i32, %arg1: i32) -> (i32, i32) {
    %c0_i32 = arith.constant 0 : i32
    %c0_i32_0 = arith.constant 0 : i32
    return %arg0, %c0_i32 : i32, i32
  }
  func.func @transform_1(%arg0: i32, %arg1: i32) -> (i32, i32) {
    %c0_i32 = arith.constant 0 : i32
    %c0_i32_0 = arith.constant 0 : i32
    return %arg0, %c0_i32 : i32, i32
  }
  func.func @transform_2(%arg0: i32, %arg1: i32) -> (i32, i32) {
    %c0_i32 = arith.constant 0 : i32
    %c0_i32_0 = arith.constant 0 : i32
    return %arg1, %c0_i32 : i32, i32
  }
  func.func @transform_3(%arg0: i32, %arg1: i32) -> (i32, i32) {
    %c0_i32 = arith.constant 0 : i32
    %c0_i32_0 = arith.constant 0 : i32
    return %arg1, %c0_i32 : i32, i32
  }
  func.func @transform_4(%arg0: i32, %arg1: i32) -> (i32, i32) {
    %c0_i32 = arith.constant 0 : i32
    %c0_i32_0 = arith.constant 0 : i32
    return %arg0, %c0_i32 : i32, i32
  }
}

</mosaic_0001>

<bundles_post_ra>
// kernel: cnn1_forward.3
= control target key start
LH: loop header
LB: loop body
LE: loop exit
PB: predicated region body
PF: predicated region fallthrough
CT: control target
= control target key end

     0   :  { %s264_s0 = inlined_call_operand.vmem [shape: bf16[8,128], index: 0, kind: input, shape index: {}, may-alias: {0,2}]   ;;  %s265_s1 = inlined_call_operand.vmem [shape: bf16[8,128], index: 1, kind: input, shape index: {}, may-alias: {1,3}]   ;;  %s266_s2 = inlined_call_operand.vmem [shape: bf16[8,128], index: 2, kind: input, shape index: {}, may-alias: {0,2}]   ;;  %s267_s3 = inlined_call_operand.vmem [shape: bf16[8,128], index: 3, kind: input, shape index: {}, may-alias: {1,3}]   ;;  %s268_s4 = inlined_call_operand.hbm [shape: f32[8,128], index: 4, kind: output, shape index: {}]  }
   0x1   :  { %v33_v0 = vld [vmem:[%s266_s2] sm:$0xf] }
   0x2   :  { %9 = vsyncpa [#allocation6], 0  ;;  %41 = vmatpush.bf16.xpose.msra.mxu0 %v33_v0  ;;  %v32_v1 = vld [vmem:[%s264_s0] sm:$0xf]  ;;  %vm48_vm0 = vcmask 64512   ;;  %vm23_vm1 = vcmask 7168   ;;  %v116_v31 = vlaneseq }
   0x3   :  { %v210_v5 = vmov -inf   ;;  %v211_v6 = vmov 0   ;;  %v212_v7 = vmov 0.0   ;;  %v80_v12 = vld [vmem:[%s267_s3] sm:$0xf]  ;;  %vm84_vm2 = vcmask 1043456  }
   0x4   :  { %24 = vst.msk [vmem:[#allocation2] sm:$0xff] %vm23_vm1, %v210_v5  ;;  %171 = vset.pattern.permute.xlu0 %v211_v6  ;;  %172 = vset.pattern.permute.xlu1 %v211_v6  ;;  %v86_v13 = vsel %vm84_vm2, %v80_v12, 0  ;;  %v117_v33 = vand.u32 127, %v116_v31  ;;  %v144_v49 = vld [vmem:[%s265_s1] sm:$0xf]  ;;  %s213_s23 = smov [#allocation5]  }
   0x5   :  { %173 = vset.pattern.permute.xlu2 %v211_v6  ;;  %25 = vst.msk [vmem:[#allocation3] sm:$0xff] %vm23_vm1, %v212_v7  ;;  %95 = vmatpush.bf16.msra.mxu1 %v86_v13  ;;  %v142_v52 = vld [vmem:[%s264_s0] sm:$0xf]  ;;  %v145_v54 = vunpack.c.l.bf16 %v144_v49  ;;  %s155_s24 = sshll.u32 %s213_s23, 4  ;;  %s157_s1 = sshll.u32 %s268_s4, 4  ;;  %s156_s24 = int_to_ptr.vmem [resolvable:$true] %s155_s24  ;;  %s158_s1 = int_to_ptr.hbm [resolvable:$true] %s157_s1 }
   0x6   :  { %vm118_vm3 = vcmp.lt.s32.totalorder %v117_v33, 32  ;;  %v143_v57 = vunpack.c.l.bf16 %v142_v52 }
   0x9   :  { %42 = vmatmul.bf16.vlgmr.msra.gmra.mxu0 %v32_v1 }
   0xb   :  { %v47_v8 = vld [vmem:[#allocation2] sm:$0xff] }
   0xc   :  { %v64_v22 = vld [vmem:[#allocation3] sm:$0xff] }
  0x86   :  { %v43_v2 = vpop.f32.mrf.mxu0 }
  0x87   :  { %v49_v3 = vsel %vm48_vm0, %v43_v2, -inf }
  0x88   :  { %50 = vmax.xlane.f32.xlu0 %v49_v3 }
  0x8e   :  { %v45_v4 = vpop.f32.mrf.mxu0 }
  0xfb   :  { %v51_v9 = vpop.xlane.xlu0 %50 }
  0xfc   :  { %v52_v10 = vmax.f32 %v47_v8, %v51_v9 }
  0xfe   :  { %v53_v11 = vsub.f32 %v47_v8, %v52_v10  ;;  %103 = vst.msk [vmem:[#allocation2] sm:$0xff] %vm23_vm1, %v52_v10  ;;  %58 = vperm.xlu0 %171, %v52_v10  }
 0x100   :  { %v54_v20 = vmul.f32 1.442695, %v53_v11 }
 0x170   :  { %v59_v14 = vpop.permute.xlu0 %58 }
 0x171   :  { %v61_v15 = vsub.f32 %v43_v2, %v59_v14 }
 0x173   :  { %v62_v16 = vmul.f32 1.442695, %v61_v15 }
 0x175   :  { %174 = vpow2.f32 %v62_v16 }
 0x176   :  { %176 = vpow2.f32 %v54_v20 }
 0x17b   :  { %v175_v17 = vpop.eup %174 }
 0x17c   :  { %v66_v18 = vsel %vm48_vm0, %v175_v17, 0.0  ;;  %v79_v19 = vpack.c.bf16 %v175_v17, %v175_v17  ;;  %v177_v21 = vpop.eup %176 }
 0x17d   :  { %67 = vadd.xlane.f32.xlu1 %v66_v18  ;;  %v65_v23 = vmul.f32 %v177_v21, %v64_v22 }
 0x17e   :  { %166 = vmatmul.msk.bf16.vlgmr.msra.gmra.mxu1 %vm48_vm0, %v79_v19 }
 0x196   :  { %75 = vperm.xlu1 %172, %v177_v21  }
 0x1f0   :  { %v68_v24 = vpop.xlane.xlu1 %67 }
 0x1f1   :  { %v69_v25 = vadd.f32 %v68_v24, %v65_v23 }
 0x1f3   :  { %71 = vst.msk [vmem:[#allocation3] sm:$0xff] %vm23_vm1, %v69_v25 }
 0x1fa   :  { %v108_v26 = vld [vmem:[#allocation3] sm:$0xff] }
 0x1fb   :  { %v97_v27 = vpop.f32.mrf.mxu1  ;;  %178 = vrcp.f32 %v108_v26 }
 0x201   :  { %v179_v28 = vpop.eup %178 }
 0x202   :  { %112 = vperm.xlu2 %173, %v179_v28  }
 0x203   :  { %v99_v29 = vpop.f32.mrf.mxu1 }
 0x208   :  { %v76_v30 = vpop.permute.xlu1 %75 }
 0x209   :  { %v78_v32 = vmul.f32 0.0, %v76_v30 }
 0x20b   :  { %v101_v34 = vadd.f32 %v97_v27, %v78_v32 }
 0x25c   :  { %v113_v35 = vpop.permute.xlu2 %112 }
 0x25d   :  { %v115_v36 = vmul.f32 %v113_v35, %v101_v34 }
 0x25f   :  { %v119_v37 = vsel %vm118_vm3, %v115_v36, -1e+30 }
 0x260   :  { %120 = vmax.xlane.f32.xlu2 %v119_v37 }
 0x2d3   :  { %v121_v38 = vpop.xlane.xlu2 %120 }
 0x2d4   :  { %v122_v39 = vsub.f32 %v119_v37, %v121_v38 }
 0x2d6   :  { %v123_v40 = vmul.f32 1.442695, %v122_v39 }
 0x2d8   :  { %180 = vpow2.f32 %v123_v40 }
 0x2de   :  { %v181_v41 = vpop.eup %180 }
 0x2df   :  { %125 = vadd.xlane.f32.xlu1 %v181_v41 }
 0x352   :  { %v126_v42 = vpop.xlane.xlu1 %125 }
 0x353   :  { %182 = vrcp.f32 %v126_v42  ;;  %v138_v46 = vand.u32 2147483648, %v126_v42  ;;  %v136_v48 = vand.u32 2147483647, %v126_v42  ;;  %vm132_vm5 = vweird.f32 %v126_v42 }
 0x355   :  { %v139_v51 = vor.u32 1.1754944e-38, %v138_v46  ;;  %vm137_vm7 = vcmp.eq.f32.partialorder %v136_v48, 8.507059e+37 }
 0x359   :  { %v183_v43 = vpop.eup %182 }
 0x35a   :  { %v128_v44 = vmul.f32 %v183_v43, %v126_v42  ;;  %vm133_vm4 = vweird.f32 %v183_v43 }
 0x35b   :  { %vm134_vm6 = vmor %vm132_vm5, %vm133_vm4 }
 0x35c   :  { %v129_v45 = vsub.f32 1.0, %v128_v44 }
 0x35e   :  { %v130_v47 = vmul.f32 %v183_v43, %v129_v45 }
 0x360   :  { %v131_v50 = vadd.f32 %v183_v43, %v130_v47 }
 0x362   :  { %v135_v53 = vsel %vm134_vm6, %v183_v43, %v131_v50 }
 0x363   :  { %v140_v55 = vsel %vm137_vm7, %v139_v51, %v135_v53 }
 0x364   :  { %v141_v56 = vmul.f32 %v181_v41, %v140_v55 }
 0x366   :  { %v146_v58 = vmul.f32 %v145_v54, %v141_v56 }
 0x368   :  { %v147_v59 = vadd.f32 %v146_v58, %v143_v57 }
 0x36a   :  { %v148_v60 = vadd.f32 %v147_v59, %v145_v54 }
 0x36c   :  { %149 = vst [vmem:[#allocation5] sm:$0xff] %v148_v60 }
 0x36d   :  { %160 = dma.vmem_to_hbm [thread:$0]  %s156_s24, 128, %s158_s1, [#allocation6]  }
 0x36e   :  { %208 = dma.done.wait [#allocation6], 128  }
 0x36f   :  { %209 = vsyncadd [#allocation6], 4294967168 }
 0x370   :  { %165 = vsyncpa [#allocation6], 1 }

// kernel: cnn1_forward.2
= control target key start
LH: loop header
LB: loop body
LE: loop exit
PB: predicated region body
PF: predicated region fallthrough
CT: control target
= control target key end

     0   :  { %s377_s3 = inlined_call_operand.vmem [shape: bf16[128,128], index: 3, kind: input, shape index: {}]   ;;  %s378_s4 = inlined_call_operand.vmem [shape: bf16[128,128], index: 4, kind: input, shape index: {}]   ;;  %s379_s2 = inlined_call_operand.vmem [shape: f32[2,128], index: 2, kind: input, shape index: {}]   ;;  %s380_s0 = inlined_call_operand.vmem [shape: bf16[8,128], index: 0, kind: input, shape index: {}]   ;;  %s381_s1 = inlined_call_operand.vmem [shape: bf16[8,128], index: 1, kind: input, shape index: {}]   ;;  %s382_s5 = inlined_call_operand.vmem [shape: bf16[8,128], index: 5, kind: output, shape index: {0}]   ;;  %s383_s6 = inlined_call_operand.vmem [shape: bf16[8,128], index: 6, kind: output, shape index: {1}]  }
   0x1   :  { %v265_v0 = vld [vmem:[%s377_s3 + $0x38] sm:$0xff]  ;;  %v264_v2 = vld [vmem:[%s377_s3 + $0x30] sm:$0xff]  ;;  %v263_v4 = vld [vmem:[%s377_s3 + $0x28] sm:$0xff] }
   0x2   :  { %v273_v1 = vld [vmem:[%s378_s4 + $0x38] sm:$0xff]  ;;  %90 = vmatpush.bf16.msra.mxu0 %v265_v0  ;;  %v272_v3 = vld [vmem:[%s378_s4 + $0x30] sm:$0xff]  ;;  %v271_v5 = vld [vmem:[%s378_s4 + $0x28] sm:$0xff] }
   0x3   :  { %169 = vmatpush.bf16.msra.mxu1 %v273_v1  ;;  %v262_v6 = vld [vmem:[%s377_s3 + $0x20] sm:$0xff]  ;;  %v261_v8 = vld [vmem:[%s377_s3 + $0x18] sm:$0xff]  ;;  %v260_v10 = vld [vmem:[%s377_s3 + $0x10] sm:$0xff] }
   0x4   :  { %v270_v7 = vld [vmem:[%s378_s4 + $0x20] sm:$0xff]  ;;  %v269_v9 = vld [vmem:[%s378_s4 + $0x18] sm:$0xff]  ;;  %v268_v11 = vld [vmem:[%s378_s4 + $0x10] sm:$0xff] }
   0x5   :  { %v259_v12 = vld [vmem:[%s377_s3 + $0x8] sm:$0xff]  ;;  %v258_v14 = vld [vmem:[%s377_s3] sm:$0xff] }
   0x6   :  { %91 = vmatpush.bf16.msra.mxu0 %v264_v2  ;;  %v267_v13 = vld [vmem:[%s378_s4 + $0x8] sm:$0xff]  ;;  %v266_v15 = vld [vmem:[%s378_s4] sm:$0xff] }
   0x7   :  { %170 = vmatpush.bf16.msra.mxu1 %v272_v3  ;;  %v24_v16 = vld [vmem:[%s380_s0] sm:$0xf] }
   0x8   :  { %v103_v17 = vld [vmem:[%s381_s1] sm:$0xf] }
   0x9   :  { %v274_v18 = vld [vmem:[%s379_s2] ss:$0 sm:$0xff]  ;;  %v275_v19 = vld [vmem:[%s379_s2 + $0x1] ss:$0 sm:$0xff] }
   0xa   :  { %92 = vmatpush.bf16.msra.mxu0 %v263_v4 }
   0xb   :  { %171 = vmatpush.bf16.msra.mxu1 %v271_v5 }
   0xe   :  { %93 = vmatpush.bf16.msra.mxu0 %v262_v6 }
   0xf   :  { %172 = vmatpush.bf16.msra.mxu1 %v270_v7 }
  0x12   :  { %94 = vmatpush.bf16.msra.mxu0 %v261_v8 }
  0x13   :  { %173 = vmatpush.bf16.msra.mxu1 %v269_v9 }
  0x16   :  { %95 = vmatpush.bf16.msra.mxu0 %v260_v10 }
  0x17   :  { %174 = vmatpush.bf16.msra.mxu1 %v268_v11 }
  0x1a   :  { %96 = vmatpush.bf16.msra.mxu0 %v259_v12 }
  0x1b   :  { %175 = vmatpush.bf16.msra.mxu1 %v267_v13 }
  0x1e   :  { %97 = vmatpush.bf16.msra.mxu0 %v258_v14 }
  0x1f   :  { %176 = vmatpush.bf16.msra.mxu1 %v266_v15 }
  0x21   :  { %98 = vmatmul.bf16.vlgmr.msra.gmra.mxu0 %v24_v16 }
  0x22   :  { %177 = vmatmul.bf16.vlgmr.msra.gmra.mxu1 %v103_v17 }
  0x9e   :  { %v99_v20 = vpop.f32.mrf.mxu0 }
  0x9f   :  { %v178_v21 = vpop.f32.mrf.mxu1  ;;  %v100_v22 = vadd.f32 %v274_v18, %v99_v20 }
  0xa0   :  { %v179_v23 = vadd.f32 %v275_v19, %v178_v21 }
  0xa1   :  { %v182_v24 = vpack.c.bf16 %v100_v22, %v100_v22 }
  0xa2   :  { %v184_v25 = vpack.c.bf16 %v179_v23, %v179_v23 }
  0xa3   :  { %183 = vst [vmem:[%s382_s5] sm:$0xf] %v182_v24 }
  0xa4   :  { %185 = vst [vmem:[%s383_s6] sm:$0xf] %v184_v25 }
  0xa6   :  { %v101_v26 = vpop.f32.mrf.mxu0 }
  0xa7   :  { %v180_v27 = vpop.f32.mrf.mxu1 }

</bundles_post_ra>
